<compile_context>
chip_gen: v5e
topology: v5e:2x2
jax: 0.10.0
libtpu: 0.0.40
codegen_flags: <defaults>
</compile_context>

<pallas_src>
import jax
import jax.numpy as jnp
from jax.experimental import pallas as pl
from jax.experimental.pallas import tpu as pltpu


def _shuffle_kernel(x_ref, o_ref):
    # x_ref: (G, chunk, S1, S2)   source channels, group-major
    # o_ref: (chunk, G, S1, S2)   destination channels (contiguous slab in HBM)
    # Leading-dim swap as G whole-tile copies; (S1, S2) minor dims are untouched,
    # so no cross-lane / XLU work is generated.
    G = x_ref.shape[0]
    for g in range(G):
        o_ref[:, g, :, :] = x_ref[g, :, :, :]


def _min_sublane(itemsize: int) -> int:
    # f32 -> 8, bf16/f16 -> 16, int8/fp8 -> 32 (sub-32-bit dtypes pack along sublanes).
    return max(8, 32 // itemsize)


def _spatial_factors(H, W, itemsize):
    """Factor H*W into (S1, S2) maximizing sublane x lane tile utilization."""
    HW = H * W
    min_sub = _min_sublane(itemsize)
    best, best_key = (H, W), (-1.0, -1)
    for S2 in range(1, HW + 1):
        if HW % S2:
            continue
        S1 = HW // S2
        lane_util = S2 / (pl.cdiv(S2, 128) * 128)
        sub_util = S1 / (pl.cdiv(S1, min_sub) * min_sub)
        key = (lane_util * sub_util, S2)  # tie-break: prefer wider (lane-dense) rows
        if key > best_key:
            best, best_key = (S1, S2), key
    return best


def _padded_channel_bytes(S1, S2, itemsize):
    """Real VMEM footprint of one (S1, S2) channel slice after (min_sublane,128) tiling."""
    min_sub = _min_sublane(itemsize)
    return (pl.cdiv(S1, min_sub) * min_sub) * (pl.cdiv(S2, 128) * 128) * itemsize


def _vmem_budget():
    """(per-block byte target, vmem_limit_bytes), adapted to this chip's VMEM size."""
    cap = 64 << 20  # conservative fallback (v7x has the smallest physical VMEM)
    try:
        info = pltpu.get_tpu_info()
        cap = int(getattr(info, "vmem_capacity_bytes", cap)) or cap
    except Exception:
        pass
    limit = min(cap // 2, 64 << 20)                   # leave half of VMEM as headroom
    target = max(2 << 20, min(8 << 20, limit // 6))   # 2x(in+out) double-buffered + slack
    return target, limit


def _pick_chunk(cpg, unit_bytes, target_bytes):
    """Channels-per-block along cpg.  Prefers a divisor of cpg (no ragged block);
    falls back to the budget-max chunk with a cdiv grid when divisors are poor."""
    max_chunk = max(1, min(cpg, target_bytes // max(unit_bytes, 1)))
    if cpg % max_chunk == 0:
        return max_chunk
    best_div = 1
    for d in range(1, max_chunk + 1):
        if cpg % d == 0:
            best_div = d
    if best_div >= max(1, max_chunk // 2):
        return best_div
    return max_chunk  # non-divisor -> ragged last block (handled by Pallas)


def channel_shuffle(x: jax.Array, groups: int = 4, *, target_bytes=None) -> jax.Array:
    """Pallas implementation of the PyTorch channel_shuffle module (NCHW)."""
    B, C, H, W = x.shape
    assert C % groups == 0, "num_channels must be divisible by groups"
    cpg = C // groups
    itemsize = x.dtype.itemsize

    S1, S2 = _spatial_factors(H, W, itemsize)
    auto_target, vmem_limit = _vmem_budget()
    if target_bytes is None:
        target_bytes = auto_target

    unit_bytes = groups * _padded_channel_bytes(S1, S2, itemsize)  # per q-channel row
    chunk = _pick_chunk(cpg, unit_bytes, target_bytes)
    n_chunks = pl.cdiv(cpg, chunk)

    block_bytes = chunk * unit_bytes
    # in + out, double-buffered, plus slack.
    # TODO(synk): tile spatially if a single (G x padded HW) slab ever exceeds VMEM.
    vmem_limit = max(vmem_limit, min(4 * block_bytes + (2 << 20), 64 << 20))

    # (B, C, H, W) -> (B, G, cpg, S1, S2): contiguous split, free.
    x_view = x.reshape(B, groups, cpg, S1, S2)

    out5 = pl.pallas_call(
        _shuffle_kernel,
        out_shape=jax.ShapeDtypeStruct((B, cpg, groups, S1, S2), x.dtype),
        grid=(B, n_chunks),
        in_specs=[
            # For output q-chunk q: all G source slabs x[:, g, q*chunk:(q+1)*chunk].
            pl.BlockSpec(
                (None, groups, chunk, S1, S2),
                lambda b, q: (b, 0, q, 0, 0),
            )
        ],
        # One fully contiguous output slab out5[b, q*chunk:(q+1)*chunk, :, :, :].
        out_specs=pl.BlockSpec(
            (None, chunk, groups, S1, S2),
            lambda b, q: (b, q, 0, 0, 0),
        ),
        compiler_params=pltpu.CompilerParams(
            dimension_semantics=("parallel", "parallel"),
            vmem_limit_bytes=int(vmem_limit),
        ),
        cost_estimate=pl.CostEstimate(
            flops=0,
            transcendentals=0,
            bytes_accessed=2 * x.size * itemsize,
        ),
    )(x_view)

    # (B, cpg, G, S1, S2) -> (B, C, H, W): contiguous merge, free.
    # Flat output channel index is q*G + g — exactly the PyTorch transpose(1, 2) order.
    return out5.reshape(B, C, H, W)


def channel_shuffle_ref(x: jax.Array, groups: int = 4) -> jax.Array:
    """Pure-JAX reference mirroring the PyTorch forward."""
    B, C, H, W = x.shape
    cpg = C // groups
    y = x.reshape(B, groups, cpg, H, W)
    y = jnp.transpose(y, (0, 2, 1, 3, 4))
    return y.reshape(B, C, H, W)


if __name__ == "__main__":
    key = jax.random.PRNGKey(0)

    cases = [
        # (shape, groups, dtype, target_bytes override)
        ((2, 8, 16, 16), 4, jnp.float32, None),         # baseline small shape
        ((1, 20, 14, 14), 4, jnp.float32, 64 * 1024),   # multi-chunk + ragged last block
        ((1, 16, 7, 7), 4, jnp.bfloat16, None),         # small spatial, 16-sublane dtype
    ]

    for i, (shape, groups, dtype, tb) in enumerate(cases):
        key, sub = jax.random.split(key)
        x = jax.random.normal(sub, shape, dtype=jnp.float32).astype(dtype)

        out = jax.block_until_ready(channel_shuffle(x, groups=groups, target_bytes=tb))
        ref = channel_shuffle_ref(x, groups=groups)

        assert out.shape == ref.shape, f"shape mismatch in case {i}"
        assert out.dtype == ref.dtype, f"dtype mismatch in case {i}"
        assert jnp.array_equal(out, ref), f"Pallas channel_shuffle mismatch in case {i}: {shape} {dtype}"

    print("KERNEL_OK")
</pallas_src>

<mosaic_0001>
module attributes {stable_mosaic.version = 11 : i64} {
  func.func @_shuffle_kernel(%arg0: i32, %arg1: i32, %arg2: memref<1x4x2x2x128xf32, #tpu.memory_space<vmem>>, %arg3: memref<1x2x4x2x128xf32, #tpu.memory_space<vmem>>) attributes {dimension_semantics = [#tpu.dimension_semantics<parallel>, #tpu.dimension_semantics<parallel>], iteration_bounds = array<i64: 2, 1>, scalar_prefetch = 0 : i64, scratch_operands = 0 : i64, tpu.core_type = #tpu.core_type<tc>, window_params = [{transform_indices = @transform_0, window_bounds = array<i64: 1, 4, 2, 2, 128>}, {transform_indices = @transform_1, window_bounds = array<i64: 1, 2, 4, 2, 128>}]} {
    %c0 = arith.constant 0 : index
    %c0_0 = arith.constant 0 : index
    %c0_1 = arith.constant 0 : index
    %c0_2 = arith.constant 0 : index
    %c0_3 = arith.constant 0 : index
    %0 = vector.load %arg2[%c0, %c0_0, %c0_1, %c0_2, %c0_3] : memref<1x4x2x2x128xf32, #tpu.memory_space<vmem>>, vector<1x1x2x2x128xf32>
    %1 = vector.shape_cast %0 : vector<1x1x2x2x128xf32> to vector<2x2x128xf32>
    %c0_4 = arith.constant 0 : index
    %c0_5 = arith.constant 0 : index
    %c0_6 = arith.constant 0 : index
    %c0_7 = arith.constant 0 : index
    %c0_8 = arith.constant 0 : index
    %2 = vector.load %arg3[%c0_4, %c0_5, %c0_6, %c0_7, %c0_8] : memref<1x2x4x2x128xf32, #tpu.memory_space<vmem>>, vector<1x2x1x2x128xf32>
    %3 = vector.shape_cast %2 : vector<1x2x1x2x128xf32> to vector<2x2x128xf32>
    %4 = vector.shape_cast %1 : vector<2x2x128xf32> to vector<1x2x1x2x128xf32>
    tpu.vector_store %arg3[%c0_4, %c0_5, %c0_6, %c0_7, %c0_8], %4 {strides = array<i32>} : memref<1x2x4x2x128xf32, #tpu.memory_space<vmem>>, vector<1x2x1x2x128xf32>,
    %c0_9 = arith.constant 0 : index
    %c1 = arith.constant 1 : index
    %c0_10 = arith.constant 0 : index
    %c0_11 = arith.constant 0 : index
    %c0_12 = arith.constant 0 : index
    %5 = vector.load %arg2[%c0_9, %c1, %c0_10, %c0_11, %c0_12] : memref<1x4x2x2x128xf32, #tpu.memory_space<vmem>>, vector<1x1x2x2x128xf32>
    %6 = vector.shape_cast %5 : vector<1x1x2x2x128xf32> to vector<2x2x128xf32>
    %c0_13 = arith.constant 0 : index
    %c0_14 = arith.constant 0 : index
    %c1_15 = arith.constant 1 : index
    %c0_16 = arith.constant 0 : index
    %c0_17 = arith.constant 0 : index
    %7 = vector.load %arg3[%c0_13, %c0_14, %c1_15, %c0_16, %c0_17] : memref<1x2x4x2x128xf32, #tpu.memory_space<vmem>>, vector<1x2x1x2x128xf32>
    %8 = vector.shape_cast %7 : vector<1x2x1x2x128xf32> to vector<2x2x128xf32>
    %9 = vector.shape_cast %6 : vector<2x2x128xf32> to vector<1x2x1x2x128xf32>
    tpu.vector_store %arg3[%c0_13, %c0_14, %c1_15, %c0_16, %c0_17], %9 {strides = array<i32>} : memref<1x2x4x2x128xf32, #tpu.memory_space<vmem>>, vector<1x2x1x2x128xf32>,
    %c0_18 = arith.constant 0 : index
    %c2 = arith.constant 2 : index
    %c0_19 = arith.constant 0 : index
    %c0_20 = arith.constant 0 : index
    %c0_21 = arith.constant 0 : index
    %10 = vector.load %arg2[%c0_18, %c2, %c0_19, %c0_20, %c0_21] : memref<1x4x2x2x128xf32, #tpu.memory_space<vmem>>, vector<1x1x2x2x128xf32>
    %11 = vector.shape_cast %10 : vector<1x1x2x2x128xf32> to vector<2x2x128xf32>
    %c0_22 = arith.constant 0 : index
    %c0_23 = arith.constant 0 : index
    %c2_24 = arith.constant 2 : index
    %c0_25 = arith.constant 0 : index
    %c0_26 = arith.constant 0 : index
    %12 = vector.load %arg3[%c0_22, %c0_23, %c2_24, %c0_25, %c0_26] : memref<1x2x4x2x128xf32, #tpu.memory_space<vmem>>, vector<1x2x1x2x128xf32>
    %13 = vector.shape_cast %12 : vector<1x2x1x2x128xf32> to vector<2x2x128xf32>
    %14 = vector.shape_cast %11 : vector<2x2x128xf32> to vector<1x2x1x2x128xf32>
    tpu.vector_store %arg3[%c0_22, %c0_23, %c2_24, %c0_25, %c0_26], %14 {strides = array<i32>} : memref<1x2x4x2x128xf32, #tpu.memory_space<vmem>>, vector<1x2x1x2x128xf32>,
    %c0_27 = arith.constant 0 : index
    %c3 = arith.constant 3 : index
    %c0_28 = arith.constant 0 : index
    %c0_29 = arith.constant 0 : index
    %c0_30 = arith.constant 0 : index
    %15 = vector.load %arg2[%c0_27, %c3, %c0_28, %c0_29, %c0_30] : memref<1x4x2x2x128xf32, #tpu.memory_space<vmem>>, vector<1x1x2x2x128xf32>
    %16 = vector.shape_cast %15 : vector<1x1x2x2x128xf32> to vector<2x2x128xf32>
    %c0_31 = arith.constant 0 : index
    %c0_32 = arith.constant 0 : index
    %c3_33 = arith.constant 3 : index
    %c0_34 = arith.constant 0 : index
    %c0_35 = arith.constant 0 : index
    %17 = vector.load %arg3[%c0_31, %c0_32, %c3_33, %c0_34, %c0_35] : memref<1x2x4x2x128xf32, #tpu.memory_space<vmem>>, vector<1x2x1x2x128xf32>
    %18 = vector.shape_cast %17 : vector<1x2x1x2x128xf32> to vector<2x2x128xf32>
    %19 = vector.shape_cast %16 : vector<2x2x128xf32> to vector<1x2x1x2x128xf32>
    tpu.vector_store %arg3[%c0_31, %c0_32, %c3_33, %c0_34, %c0_35], %19 {strides = array<i32>} : memref<1x2x4x2x128xf32, #tpu.memory_space<vmem>>, vector<1x2x1x2x128xf32>,
    return
  }
  func.func @transform_0(%arg0: i32, %arg1: i32) -> (i32, i32, i32, i32, i32) {
    %c0_i32 = arith.constant 0 : i32
    %c0_i32_0 = arith.constant 0 : i32
    %c0_i32_1 = arith.constant 0 : i32
    %c0_i32_2 = arith.constant 0 : i32
    return %arg0, %c0_i32, %arg1, %c0_i32_0, %c0_i32_1 : i32, i32, i32, i32, i32
  }
  func.func @transform_1(%arg0: i32, %arg1: i32) -> (i32, i32, i32, i32, i32) {
    %c0_i32 = arith.constant 0 : i32
    %c0_i32_0 = arith.constant 0 : i32
    %c0_i32_1 = arith.constant 0 : i32
    %c0_i32_2 = arith.constant 0 : i32
    return %arg0, %arg1, %c0_i32, %c0_i32_0, %c0_i32_1 : i32, i32, i32, i32, i32
  }
}

</mosaic_0001>

<bundles_post_ra>
// kernel: tpu_custom_call.1
= control target key start
LH: loop header
LB: loop body
LE: loop exit
PB: predicated region body
PF: predicated region fallthrough
CT: control target
= control target key end

     0   :  { %6 = vsyncpa [#allocation3], 0  ;;  %s628_s0 = inlined_call_operand.hbm [shape: f32[2,4,2,2,128], index: 0, kind: input, shape index: {}]   ;;  %s629_s1 = inlined_call_operand.hbm [shape: f32[2,2,4,2,128], index: 1, kind: output, shape index: {}]  }
   0x1   :  { %8 = vsyncpa [#allocation3 + $0x1], 0 }
   0x2   :  { %9 = vsyncpa [#allocation4], 0 }
   0x3   :  { %11 = vsyncpa [#allocation4 + $0x1], 0  ;;  %s508_s6 = smov 0   ;;  %s510_s7 = smov 0  }
   0x4   :  { %s512_s8 = smov 0   ;;  %s514_s9 = smov 0  }
   0x5   :  { %s516_s10 = smov 0   ;;  %s518_s11 = smov 0  }
   0x6 LB: > { %s285_s12 = sadd.s32 4294967295, %s492_s11   ;;  %s286_s13 = sadd.s32 4294967294, %s492_s11   ;;  %s492_s11 = sphi %s518_s11, %s17_s11   ;;  %s488_s10 = sphi %s516_s10, %s638_s10   ;;  %s484_s9 = sphi %s514_s9, %s637_s9   ;;  %s480_s8 = sphi %s512_s8, %s636_s8   ;;  %s476_s7 = sphi %s510_s7, %s635_s7   ;;  %s472_s6 = sphi %s508_s6, %s634_s6  }
   0x7   : > { %s29_s14 = sadd.s32 1, %s488_s10  ;;  %s38_s15 = sadd.s32 1, %s480_s8 }
   0x8   : > { %p31_p0 = scmp.ge.s32.totalorder %s29_s14, 2  ;;  %p45_p1 = scmp.ne.s32.totalorder %s480_s8, %s476_s7 }
   0x9   : > { %p46_p2 = scmp.eq.s32.totalorder %s492_s11, 0  ;;  %p51_p3 = scmp.ne.s32.totalorder %s476_s7, %s472_s6 }
   0xa   : > { %s640_s14 = smov (%p31_p0, %s29_s14), 0  ;;  %p52_p5 = scmp.eq.s32.totalorder %s285_s12, 0 }
   0xb   : > { %p549_p4 = por %p46_p2, %p45_p1  ;;  %s33_s17 = ssub.s32 %s488_s10, %s640_s14 }
   0xc   : > { %p77_p6 = scmp.eq.s32.totalorder %s285_s12, 1  ;;  %p36_p7 = scmp.eq.s32.totalorder %s33_s17, 0 }
   0xd   : > { %p555_p8 = por %p52_p5, %p51_p3  ;;  %p83_p10 = scmp.eq.s32.totalorder %s286_s13, 1 }
   0xe   : > { %p559_p9 = por %p77_p6, %p45_p1  ;;  %p288_p12 = scmp.ge.s32.totalorder %s492_s11, 2 }
   0xf   : > { %s564_s20 = scalar_select %p36_p7, %s480_s8, %s38_s15  }
  0x10   : > { %p566_p11 = por %p83_p10, %p51_p3  ;;  %p326_p13 = scmp.lt.s32.totalorder %s492_s11, 2 }
  0x11   : > { %s103_s22 = sand.u32 1, %s480_s8   ;;  %s312_s24 = sshll.u32 %s488_s10, 4 }
  0x12   : > { %s289_s23 = sshll.u32 %s103_s22, 4  ;;  %s114_s27 = scalar_lea.hbm %s628_s0, %s312_s24 }
  0x13   : > { %s107_s28 = scalar_lea.vmem [#allocation2], %s289_s23  ;;  %s115_s30 = sshll.u32 %s114_s27, 4  ;;  %s116_s30 = int_to_ptr.hbm [resolvable:$true] %s115_s30 }
  0x14   : > { %s117_s29 = sshll.u32 %s107_s28, 4  ;;  %p319_p0 = pnand %p326_p13, %p549_p4  ;;  %s118_s29 = int_to_ptr.vmem [resolvable:$true] %s117_s29 }
  0x15   : > { %p292_p1 = scmp.ge.s32.totalorder %s492_s11, 1  ;;  %s104_s2 = scalar_lea.sflag [#allocation3], %s103_s22 }
  0x16   : > { %s494_s3 = smov 32   ;;  %s495_s4 = smov 2  }
  0x17   : > { %321 = dma.hbm_to_vmem [thread:$0]  (!%p319_p0), %s116_s30, 256, %s118_s29, %s104_s2, %s494_s3, %s494_s3, %s495_s4  }
  0x18   : > { %p125_p2 = scmp.lt.s32.totalorder %s492_s11, 3 }
  0x1a   : > { %p126_p3 = pnand %p292_p1, %p125_p2 }
  0x1b   : > { %s582_s5 = sand.u32 (!%p126_p3), 1, %s476_s7  }
  0x1c   : > { %129 = sbr.rel (%p126_p3) target bundleno = 51 (0x33), region = 24  ;;  %s293_s12 = sshll.u32 (!%p126_p3), %s582_s5, 4 }
  0x1d   : > { %s132_s13 = scalar_lea.sflag (!%p126_p3), [#allocation3], %s582_s5  ;;  %s135_s15 = scalar_lea.vmem (!%p126_p3), [#allocation2], %s293_s12 }
  0x21   : > { %463 = dma.done.wait (%p555_p8), %s132_s13, 256  }
  0x22   : > { %465 = vsyncadd (%p555_p8), %s132_s13, 4294967040  ;;  %s313_s16 = sshll.u32 %s484_s9, 4  ;;  %v157_v0 = vld [vmem:[%s135_s15] sm:$0x3]  ;;  %v158_v1 = vld [vmem:[%s135_s15 + $0x2] sm:$0x3] }
  0x23   : > { %v295_v2 = vld [vmem:[%s135_s15 + $0x4] sm:$0x3]  ;;  %s194_s23 = scalar_lea.hbm %s629_s1, %s313_s16  ;;  %s154_s24 = scalar_lea.vmem [#allocation5], %s293_s12  ;;  %v296_v3 = vld [vmem:[%s135_s15 + $0x6] sm:$0x3] }
  0x24   : > { %159 = vst [vmem:[%s154_s24] sm:$0x3] %v157_v0  ;;  %s195_s25 = sshll.u32 %s154_s24, 4  ;;  %v299_v4 = vld [vmem:[%s135_s15 + $0x8] sm:$0x3]  ;;  %v300_v5 = vld [vmem:[%s135_s15 + $0xa] sm:$0x3]  ;;  %s196_s25 = int_to_ptr.vmem [resolvable:$true] %s195_s25 }
  0x25   : > { %160 = vst [vmem:[%s154_s24 + $0x8] sm:$0x3] %v158_v1  ;;  %s197_s18 = sshll.u32 %s194_s23, 4  ;;  %v303_v6 = vld [vmem:[%s135_s15 + $0xc] sm:$0x3]  ;;  %s180_s9 = scalar_lea.sflag [#allocation4], %s582_s5  ;;  %s198_s18 = int_to_ptr.hbm [resolvable:$true] %s197_s18 }
  0x26   : > { %297 = vst [vmem:[%s154_s24 + $0x2] sm:$0x3] %v295_v2  ;;  %v304_v7 = vld [vmem:[%s135_s15 + $0xe] sm:$0x3]  ;;  %s424_s26 = sshra.s32 %s198_s18, 4  ;;  %s430_s30 = scalar_lea.hbm %s629_s1, 32  ;;  %s425_s26 = int_to_ptr.hbm [resolvable:$true] %s424_s26 }
  0x27   : > { %298 = vst [vmem:[%s154_s24 + $0xa] sm:$0x3] %v296_v3  ;;  %s426_s27 = scalar_lea.hbm %s425_s26, 16  ;;  %p431_p7 = scmp.lt.s32.totalorder %s425_s26, %s629_s1 }
  0x28   : > { %301 = vst [vmem:[%s154_s24 + $0x4] sm:$0x3] %v299_v4  ;;  %p427_p4 = scmp.ne.s32.totalorder %s425_s26, %s426_s27  ;;  %p432_p8 = scmp.lt.s32.totalorder %s430_s30, %s426_s27 }
  0x29   : > { %302 = vst [vmem:[%s154_s24 + $0xc] sm:$0x3] %v300_v5 }
  0x2a   : > { %305 = vst [vmem:[%s154_s24 + $0x6] sm:$0x3] %v303_v6  ;;  %p428_p5 = pnand %p427_p4, %p559_p9  ;;  %p433_p10 = por %p432_p8, %p431_p7 }
  0x2b   : > { %306 = vst [vmem:[%s154_s24 + $0xe] sm:$0x3] %v304_v7 }
  0x2c   : > { %p429_p6 = pneg %p428_p5 }
  0x2e   : > { %p434_p13 = pnand %p433_p10, %p429_p6 }
  0x30   : > { %437 = shalt.err (!%p434_p13)
}
  0x31   : > { %s496_s4 = smov 32   ;;  %s497_s5 = smov 2  }
  0x32   : > { %316 = dma.vmem_to_hbm [thread:$0]  (%p559_p9), %s196_s25, 256, %s198_s18, %s180_s9, %s496_s4, %s496_s4, %s497_s5  }
  0x33 PF: > { %s212_s12 = sand.u32 1, %s472_s6   ;;  %p323_p0 = pnand %p288_p12, %p566_p11 }
  0x34   : > { %s213_s13 = scalar_lea.sflag [#allocation4], %s212_s12 }
  0x35   : > { %p324_p1 = pneg %p323_p0 }
  0x37   : > { %467 = dma.done.wait (%p324_p1), %s213_s13, 256  }
  0x38   : > { %469 = vsyncadd (%p324_p1), %s213_s13, 4294967040  ;;  %s17_s11 = sadd.s32 1, %s492_s11   ;;  %s634_s6 = smov %s476_s7 }
  0x39   : > { %p14_p2 = scmp.ge.s32.totalorder %s17_s11, 4   ;;  %s635_s7 = smov %s480_s8 }
  0x3a   : > { %s636_s8 = smov %s564_s20  ;;  %s637_s9 = smov %s488_s10 }
  0x3b   : > { %s638_s10 = smov %s640_s14  ;;  %16 = sbr.rel (!%p14_p2) target bundleno = 6 (0x6), region = 75 }
  0x40   :  { %219 = vsyncpa [#allocation3], 1 }
  0x41   :  { %221 = vsyncpa [#allocation3 + $0x1], 1 }
  0x42   :  { %222 = vsyncpa [#allocation4], 1 }
  0x43   :  { %224 = vsyncpa [#allocation4 + $0x1], 1 }

</bundles_post_ra>
